<compile_context>
chip_gen: v7x
topology: tpu7x:2x2x1
jax: 0.10.0
libtpu: 0.0.40
codegen_flags: <defaults>
</compile_context>

<pallas_src>
import functools

import jax
import jax.numpy as jnp
from jax import lax
from jax.experimental import pallas as pl
from jax.experimental.pallas import tpu as pltpu


def _pow_p(x, p):
    """x ** p for x > 0 (f32 tile) and a traced scalar p.

    Fast path (lax.cond): p is an integer in [1, 4] -> at most 3 VPU multiplies
    plus 3 selects per element.  Fallback: exp(p * log(x)) on the EUP.
    """
    n_f = jnp.floor(p + 0.5)
    n = n_f.astype(jnp.int32)
    use_int = (jnp.abs(p - n_f) < 1e-6) & (n >= 1) & (n <= 4)

    def int_path(v):
        v2 = v * v
        lo = jnp.where(n == 1, v, v2)              # n in {1, 2}
        hi = jnp.where(n == 3, v2 * v, v2 * v2)    # n in {3, 4}
        return jnp.where(n <= 2, lo, hi)

    def gen_path(v):
        return jnp.exp(jnp.log(v) * p)

    return lax.cond(use_int, int_path, gen_path, x)


def _gem_kernel_single(p_ref, x_ref, o_ref, *, eps, inv_hw):
    # Whole spatial extent resident in one block: clamp, pow, lane reduce,
    # mean and the 1/p root all in a single grid step (no accumulator).
    p = p_ref[0]
    x = x_ref[...].astype(jnp.float32)
    xp = _pow_p(jnp.maximum(x, eps), p)
    # Mosaic masks pad lanes internally for the reduce (hw need not be a
    # multiple of 128 here).
    mean = jnp.sum(xp, axis=-1, keepdims=True) * inv_hw
    # Root is per-row only (row_block elements) -> negligible EUP work.
    o_ref[...] = jnp.exp(jnp.log(mean) * (1.0 / p)).astype(o_ref.dtype)


def _gem_kernel_multi(p_ref, x_ref, o_ref, acc_ref, *, eps, hw, hw_block,
                      need_mask):
    # Chunked spatial axis: grid = (row_tiles, hw_tiles), hw innermost
    # ("arbitrary") with a lane-dense (row_block, 128) f32 accumulator.
    k = pl.program_id(1)

    @pl.when(k == 0)
    def _init():
        acc_ref[...] = jnp.zeros_like(acc_ref)

    p = p_ref[0]
    x = x_ref[...].astype(jnp.float32)
    xp = _pow_p(jnp.maximum(x, eps), p)

    if need_mask:
        # Ragged last hw chunk: (1, hw_block) lane iota, broadcast by the
        # select.  Also squashes NaN/garbage from the overhanging HBM read.
        lane = lax.broadcasted_iota(jnp.int32, (1, hw_block), 1) + k * hw_block
        xp = jnp.where(lane < hw, xp, 0.0)

    # Lane-dense accumulation: fold hw_block (a multiple of 128) down to 128
    # lanes with a VPU add tree; defer the single 128->1 cross-lane (XLU)
    # reduce to the finalize step.
    chunks = [xp[:, j * 128:(j + 1) * 128] for j in range(hw_block // 128)]
    while len(chunks) > 1:
        nxt = [a + b for a, b in zip(chunks[0::2], chunks[1::2])]
        if len(chunks) % 2:
            nxt.append(chunks[-1])
        chunks = nxt
    acc_ref[...] += chunks[0]

    @pl.when(k == pl.num_programs(1) - 1)
    def _finalize():
        mean = jnp.sum(acc_ref[...], axis=-1, keepdims=True) * (1.0 / hw)
        o_ref[...] = jnp.exp(jnp.log(mean) * (1.0 / p)).astype(o_ref.dtype)


def _round_up(a, b):
    return pl.cdiv(a, b) * b


def _choose_tiles(rows, hw, itemsize, max_block_bytes):
    """Pick (row_block, hw_block) for the flattened (rows, hw) view.

    Regime A (single hw tile): the whole lane-padded spatial extent fits for
    at least 8 rows -> hw_block = hw, grow row_block to the block budget
    (single-TC chips iterate the grid serially, so fewer / bigger tiles win).
    Regime B: chunk hw in 128-lane multiples, keeping row tiles tall (>= 256
    rows when available) so per-grid-step overhead stays amortized.
    """
    rows8 = _round_up(rows, 8)
    lane_full = _round_up(hw, 128)
    if hw < 128 or 8 * lane_full * itemsize <= max_block_bytes:
        hw_block = hw
        row_block = (max_block_bytes // (lane_full * itemsize)) // 8 * 8
        row_block = max(8, min(rows8, row_block))
        return row_block, hw_block
    # Regime B (hw >= 128 guaranteed here).
    row_block = max(8, min(rows8, 512))
    hw_block = (max_block_bytes // (row_block * itemsize)) // 128 * 128
    hw_block = max(128, min(hw_block, (hw // 128) * 128))
    return row_block, hw_block


def _tpu_vmem_capacity_bytes():
    try:
        return int(pltpu.get_tpu_info().vmem_capacity_bytes)
    except Exception:
        return 64 * 1024 * 1024   # conservative default: v7x per-TC VMEM


def gem_pool(x, p, eps=1e-6, *, max_block_bytes=None):
    """GeM pooling.  x: (N, C, H, W), p: (1,) float.  Returns (N, C, 1, 1)."""
    N, C, H, W = x.shape
    rows, hw = N * C, H * W
    # NOTE: for small spatial extents (hw < 128, e.g. 7x7) lane occupancy is
    # hw/128 which caps per-element VPU/EUP throughput; HBM reads stay dense
    # so the streaming roofline is roughly preserved.
    # TODO(synk): fold floor(128/hw) rows into the lane axis (segmented sum)
    # to recover full lane occupancy for tiny H*W.
    x2d = x.reshape(rows, hw)

    vmem_cap = _tpu_vmem_capacity_bytes()
    if max_block_bytes is None:
        # ~8 MiB blocks on 128 MiB-VMEM chips (v5e/v6e), ~5 MiB on v7x's
        # 64 MiB/TC; double-buffered input + f32 temporaries stay well within
        # the scoped limit below.
        max_block_bytes = min(8 * 1024 * 1024, max(1 << 20, vmem_cap // 12))
    vmem_limit = max(32 * 1024 * 1024, min(vmem_cap * 3 // 4, 96 * 1024 * 1024))

    itemsize = jnp.dtype(x.dtype).itemsize
    row_block, hw_block = _choose_tiles(rows, hw, itemsize, max_block_bytes)
    row_tiles = pl.cdiv(rows, row_block)
    hw_tiles = pl.cdiv(hw, hw_block)

    p_f32 = p.reshape((1,)).astype(jnp.float32)

    if hw_tiles == 1:
        kernel = functools.partial(_gem_kernel_single, eps=float(eps),
                                   inv_hw=1.0 / hw)
        out = pl.pallas_call(
            kernel,
            out_shape=jax.ShapeDtypeStruct((row_tiles * row_block, 1),
                                           jnp.float32),
            grid=(row_tiles,),
            in_specs=[
                pl.BlockSpec(memory_space=pltpu.MemorySpace.SMEM),      # p (1,)
                pl.BlockSpec((row_block, hw_block), lambda i: (i, 0)),  # x tile
            ],
            out_specs=pl.BlockSpec((row_block, 1), lambda i: (i, 0)),
            compiler_params=pltpu.CompilerParams(
                # TODO(synk): on v7x try CORE_PARALLEL on the row axis so both
                # TensorCores split the row tiles.
                dimension_semantics=("parallel",),
                vmem_limit_bytes=vmem_limit),
        )(p_f32, x2d)
    else:
        assert hw_block % 128 == 0, "chunked-hw path requires 128-lane blocks"
        kernel = functools.partial(
            _gem_kernel_multi, eps=float(eps), hw=hw, hw_block=hw_block,
            need_mask=(hw % hw_block) != 0)
        out = pl.pallas_call(
            kernel,
            out_shape=jax.ShapeDtypeStruct((row_tiles * row_block, 1),
                                           jnp.float32),
            grid=(row_tiles, hw_tiles),
            in_specs=[
                pl.BlockSpec(memory_space=pltpu.MemorySpace.SMEM),
                pl.BlockSpec((row_block, hw_block), lambda i, k: (i, k)),
            ],
            out_specs=pl.BlockSpec((row_block, 1), lambda i, k: (i, 0)),
            scratch_shapes=[pltpu.VMEM((row_block, 128), jnp.float32)],
            compiler_params=pltpu.CompilerParams(
                dimension_semantics=("parallel", "arbitrary"),
                vmem_limit_bytes=vmem_limit),
        )(p_f32, x2d)

    # Ragged row edge blocks read past N*C; rows are independent so the
    # garbage rows never contaminate valid rows and are sliced off here.
    return out[:rows].reshape(N, C, 1, 1).astype(x.dtype)


def gem_ref(x, p, eps=1e-6):
    xc = jnp.maximum(x.astype(jnp.float32), eps)
    xp = xc ** p[0]
    m = jnp.mean(xp, axis=(2, 3), keepdims=True)
    return m ** (1.0 / p[0])


if __name__ == "__main__":
    key = jax.random.PRNGKey(0)
    # Deterministic parameter init, matching nn.Parameter(torch.ones(1) * 3).
    p = jnp.ones((1,), dtype=jnp.float32) * 3.0
    eps = 1e-6

    # Case 1: shape from the module spec (integer-p fast path, single hw tile).
    x1 = jax.random.normal(key, (2, 4, 16, 16), dtype=jnp.float32)
    o1 = gem_pool(x1, p, eps)
    jax.block_until_ready(o1)
    assert o1.shape == (2, 4, 1, 1), o1.shape
    assert jnp.allclose(o1, gem_ref(x1, p, eps), rtol=1e-4, atol=1e-5)

    # Case 2: ragged rows (N*C not a multiple of 8) and H*W not a multiple of
    # 128 -- exercises Pallas edge-block handling.
    x2 = jax.random.normal(jax.random.PRNGKey(1), (3, 5, 14, 14),
                           dtype=jnp.float32)
    o2 = gem_pool(x2, p, eps)
    jax.block_until_ready(o2)
    assert o2.shape == (3, 5, 1, 1), o2.shape
    assert jnp.allclose(o2, gem_ref(x2, p, eps), rtol=1e-4, atol=1e-5)

    # Case 3: force the chunked-hw path (multi hw grid steps, lane-dense
    # accumulator, ragged-lane masking) by shrinking the block budget.
    o3 = gem_pool(x2, p, eps, max_block_bytes=4096)
    jax.block_until_ready(o3)
    assert jnp.allclose(o3, gem_ref(x2, p, eps), rtol=1e-4, atol=1e-5)

    # Case 4: bf16 input -- compute stays f32, output cast back to bf16.
    x4 = x1.astype(jnp.bfloat16)
    o4 = gem_pool(x4, p, eps)
    jax.block_until_ready(o4)
    assert o4.dtype == jnp.bfloat16
    assert jnp.allclose(o4.astype(jnp.float32), gem_ref(x4, p, eps),
                        rtol=5e-2, atol=5e-2)

    # Case 5: non-integer p -- exercises the exp/log fallback branch of the
    # lax.cond dispatch.
    p_frac = jnp.ones((1,), dtype=jnp.float32) * 2.5
    o5 = gem_pool(x1, p_frac, eps)
    jax.block_until_ready(o5)
    assert jnp.allclose(o5, gem_ref(x1, p_frac, eps), rtol=1e-3, atol=1e-5)

    print("KERNEL_OK")
</pallas_src>

<mosaic_0001>
module attributes {stable_mosaic.version = 11 : i64} {
  func.func @_gem_kernel_single(%arg0: i32, %arg1: memref<1xf32, #tpu.memory_space<smem>>, %arg2: memref<8x256xf32, #tpu.memory_space<vmem>>, %arg3: memref<8x1xf32, #tpu.memory_space<vmem>>) attributes {dimension_semantics = [#tpu.dimension_semantics<parallel>], iteration_bounds = array<i64: 1>, scalar_prefetch = 0 : i64, scratch_operands = 0 : i64, tpu.core_type = #tpu.core_type<tc>, window_params = [{transform_indices = @transform_0, window_bounds = array<i64: 1>}, {transform_indices = @transform_1, window_bounds = array<i64: 8, 256>}, {transform_indices = @transform_2, window_bounds = array<i64: 8, 1>}]} {
    %c0 = arith.constant 0 : index
    %0 = memref.load %arg1[%c0] : memref<1xf32, #tpu.memory_space<smem>>
    %c0_0 = arith.constant 0 : index
    %c0_1 = arith.constant 0 : index
    %1 = vector.load %arg2[%c0_0, %c0_1] : memref<8x256xf32, #tpu.memory_space<vmem>>, vector<8x256xf32>
    %cst = arith.constant 9.99999997E-7 : f32
    %2 = vector.broadcast %cst : f32 to vector<8x256xf32>
    %3 = arith.maximumf %1, %2 : vector<8x256xf32>
    %cst_2 = arith.constant 5.000000e-01 : f32
    %4 = arith.addf %0, %cst_2 : f32
    %5 = math.floor %4 : f32
    %6 = arith.fptosi %5 : f32 to i32
    %7 = arith.subf %0, %5 : f32
    %8 = math.absf %7 : f32
    %cst_3 = arith.constant 9.99999997E-7 : f32
    %9 = arith.cmpf olt, %8, %cst_3 : f32
    %c1_i32 = arith.constant 1 : i32
    %10 = arith.cmpi sge, %6, %c1_i32 : i32
    %11 = arith.andi %9, %10 : i1
    %c4_i32 = arith.constant 4 : i32
    %12 = arith.cmpi sle, %6, %c4_i32 : i32
    %13 = arith.andi %11, %12 : i1
    %14 = arith.extui %13 : i1 to i32
    %c0_i32 = arith.constant 0 : i32
    %15 = arith.cmpi ne, %14, %c0_i32 : i32
    %16 = scf.if %15 -> (vector<8x256xf32>) {
      %27 = arith.mulf %3, %3 : vector<8x256xf32>
      %c1_i32_9 = arith.constant 1 : i32
      %28 = arith.cmpi eq, %6, %c1_i32_9 : i32
      %29 = arith.select %28, %3, %27 : vector<8x256xf32>
      %c3_i32 = arith.constant 3 : i32
      %30 = arith.cmpi eq, %6, %c3_i32 : i32
      %31 = arith.mulf %27, %3 : vector<8x256xf32>
      %32 = arith.mulf %27, %27 : vector<8x256xf32>
      %33 = arith.select %30, %31, %32 : vector<8x256xf32>
      %c2_i32 = arith.constant 2 : i32
      %34 = arith.cmpi sle, %6, %c2_i32 : i32
      %35 = arith.select %34, %29, %33 : vector<8x256xf32>
      scf.yield %35 : vector<8x256xf32>
    } else {
      %27 = math.log %3 : vector<8x256xf32>
      %28 = vector.broadcast %0 : f32 to vector<8x256xf32>
      %29 = arith.mulf %27, %28 : vector<8x256xf32>
      %30 = math.exp %29 : vector<8x256xf32>
      scf.yield %30 : vector<8x256xf32>
    }
    %cst_4 = arith.constant dense<0.000000e+00> : vector<8xf32>
    %17 = vector.multi_reduction <add>, %16, %cst_4 [1] : vector<8x256xf32> to vector<8xf32>
    %18 = vector.shape_cast %17 : vector<8xf32> to vector<8x1xf32>
    %cst_5 = arith.constant 3.906250e-03 : f32
    %19 = vector.broadcast %cst_5 : f32 to vector<8x1xf32>
    %20 = arith.mulf %18, %19 : vector<8x1xf32>
    %21 = math.log %20 : vector<8x1xf32>
    %cst_6 = arith.constant 1.000000e+00 : f32
    %22 = arith.divf %cst_6, %0 : f32
    %23 = vector.broadcast %22 : f32 to vector<8x1xf32>
    %24 = arith.mulf %21, %23 : vector<8x1xf32>
    %25 = math.exp %24 : vector<8x1xf32>
    %c0_7 = arith.constant 0 : index
    %c0_8 = arith.constant 0 : index
    %26 = vector.load %arg3[%c0_7, %c0_8] : memref<8x1xf32, #tpu.memory_space<vmem>>, vector<8x1xf32>
    tpu.vector_store %arg3[%c0_7, %c0_8], %25 {strides = array<i32>} : memref<8x1xf32, #tpu.memory_space<vmem>>, vector<8x1xf32>,
    return
  }
  func.func @transform_0(%arg0: i32) -> i32 {
    %c0_i32 = arith.constant 0 : i32
    %c0_i32_0 = arith.constant 0 : i32
    return %c0_i32 : i32
  }
  func.func @transform_1(%arg0: i32) -> (i32, i32) {
    %c0_i32 = arith.constant 0 : i32
    %c0_i32_0 = arith.constant 0 : i32
    return %arg0, %c0_i32 : i32, i32
  }
  func.func @transform_2(%arg0: i32) -> (i32, i32) {
    %c0_i32 = arith.constant 0 : i32
    %c0_i32_0 = arith.constant 0 : i32
    return %arg0, %c0_i32 : i32, i32
  }
}

</mosaic_0001>

<bundles_post_ra>
// kernel: tpu_custom_call.1
= control target key start
LH: loop header
LB: loop body
LE: loop exit
PB: predicated region body
PF: predicated region fallthrough
CT: control target
= control target key end

     0   :  { %8 = vsyncpa [#allocation4], 0  ;;  %s167_s9 = smov [#allocation3]   ;;  %s231_s0 = inlined_call_operand.<no memory space> [shape: f32[1], index: 0, kind: input, shape index: {}]   ;;  %s232_s1 = inlined_call_operand.hbm [shape: f32[8,256], index: 1, kind: input, shape index: {}]   ;;  %s233_s2 = inlined_call_operand.vmem [shape: f32[8,1], index: 2, kind: output, shape index: {}]  }
   0x1   :  { %s17_s10 = sshll.u32 %s167_s9, 4  ;;  %s143_s13 = scalar_lea.hbm %s232_s1, 256  ;;  %s18_s10 = int_to_ptr.vmem [resolvable:$true] %s17_s10 }
   0x2   :  { %p144_p0 = scmp.ne.s32.totalorder %s232_s1, %s143_s13  ;;  %p147_p1 = scmp.lt.u32.totalorder %s143_s13, %s232_s1 }
   0x4   :  { %p149_p2 = pnand %p147_p1, %p144_p0 }
   0x6   :  { %152 = shalt.err (!%p149_p2)
}
   0x7   :  { %s153_s18 = scalar_lea.vmem %s18_s10, 256  ;;  %p158_p4 = scmp.lt.s32.totalorder %s18_s10, %s18_s10 }
   0x8   :  { %p154_p3 = scmp.ne.s32.totalorder %s18_s10, %s153_s18  ;;  %p159_p5 = scmp.lt.s32.totalorder %s153_s18, %s153_s18 }
   0xa   :  { %p160_p6 = por %p159_p5, %p158_p4 }
   0xc   :  { %p161_p7 = pnand %p160_p6, %p154_p3 }
   0xe   :  { %164 = shalt.err (!%p161_p7)
}
   0xf   :  { %20 = dma.hbm_to_vmem [thread:$0]  %s232_s1, 256, %s18_s10, [#allocation4]  }
  0x10   :  { %165 = dma.done.wait [#allocation4], 256  }
  0x11   :  { %166 = vsyncadd [#allocation4], 4294967040  ;;  %s29_s23 = sadd.f32 0.5, %s231_s0  ;;  %v76_v0 = vstv %s231_s0  ;;  %v25_v1 = vld [vmem:[#allocation3] sm:$0xff]  ;;  %v26_v2 = vld [vmem:[#allocation3 + $0x8] sm:$0xff]  ;;  %vm98_vm5 = vcmask 7168  }
  0x12   :  { %129 = vrcp.f32 %v76_v0  ;;  %v27_v3 = vmax.f32 %v25_v1, 1e-06  ;;  %v28_v4 = vmax.f32 %v26_v2, 1e-06 }
  0x13   :  { %s30_s26 = sfloor.f32 %s29_s23 }
  0x14   :  { %s106_s27 = scvt.f32.s32 %s30_s26  ;;  %s32_s30 = ssub.f32 %s231_s0, %s30_s26  ;;  %131 = vlog2.f32 %v27_v3  ;;  %v43_v8 = vmul.f32 %v27_v3, %v27_v3  ;;  %v44_v9 = vmul.f32 %v28_v4, %v28_v4 }
  0x15   :  { %133 = vlog2.f32 %v28_v4 }
  0x16   :  { %s33_s3 = sand.u32 2147483647, %s32_s30  ;;  %p35_p8 = scmp.ge.s32.totalorder %s106_s27, 1  ;;  %v52_v17 = vmul.f32 %v43_v8, %v27_v3  ;;  %v53_v18 = vmul.f32 %v44_v9, %v28_v4  ;;  %v54_v19 = vmul.f32 %v43_v8, %v43_v8  ;;  %v55_v21 = vmul.f32 %v44_v9, %v44_v9 }
  0x17   :  { %p34_p9 = scmp.lt.f32.partialorder %s33_s3, 1e-06  ;;  %p38_p11 = scmp.le.s32.totalorder %s106_s27, 4 }
  0x18   :  { %p45_p0 = scmp.eq.s32.totalorder %s106_s27, 1  ;;  %p51_p1 = scmp.eq.s32.totalorder %s106_s27, 3 }
  0x19   :  { %p36_p10 = pnand %p35_p8, %p34_p9  ;;  %p61_p2 = scmp.le.s32.totalorder %s106_s27, 2 }
  0x1a   :  { %s46_s0 = scalar_select %p45_p0, 1, 0 }
  0x1b   :  { %p37_p12 = pneg %p36_p10 }
  0x1c   :  { %v130_v5 = vpop.eup %129  ;;  %s56_s4 = scalar_select %p51_p1, 1, 0  ;;  %v47_v10 = vstv %s46_s0 }
  0x1d   :  { %p204_p13 = pnand %p38_p11, %p37_p12  ;;  %107 = vpush %v130_v5  ;;  %vm208_vm0 = vcmp.eq.s32.totalorder %v47_v10, 1 }
  0x1e   :  { %v132_v6 = vpop.eup %131  ;;  %s62_s5 = scalar_select %p61_p2, 1, 0  ;;  %v57_v13 = vstv %s56_s4  ;;  %v49_v25 = vsel %vm208_vm0, %v27_v3, %v43_v8  ;;  %v50_v28 = vsel %vm208_vm0, %v28_v4, %v44_v9 }
  0x1f   :  { %v134_v7 = vpop.eup %133  ;;  %v73_v11 = vmul.f32 0.6931472, %v132_v6  ;;  %s126_s6 = scalar_select %p204_p13, 0, 1  ;;  %vm214_vm1 = vcmp.eq.s32.totalorder %v57_v13, 1 }
  0x20   :  { %v75_v12 = vmul.f32 0.6931472, %v134_v7  ;;  %v63_v23 = vstv %s62_s5  ;;  %s118_s7 = scalar_select %p204_p13, 1, 0  ;;  %v59_v26 = vsel %vm214_vm1, %v52_v17, %v54_v19  ;;  %v60_v29 = vsel %vm214_vm1, %v53_v18, %v55_v21 }
  0x21   :  { %v77_v14 = vmul.f32 %v76_v0, %v73_v11  ;;  %vm64_vm2 = vcmp.eq.s32.totalorder %v63_v23, 1  ;;  %v111_v27 = vstv %s126_s6 }
  0x22   :  { %v78_v16 = vmul.f32 %v76_v0, %v75_v12  ;;  %v65_v30 = vsel %vm64_vm2, %v49_v25, %v59_v26  ;;  %vm112_vm3 = vcmp.ne.s32.totalorder %v111_v27, 0  ;;  %v119_v31 = vstv %s118_s7 }
  0x23   :  { %v79_v20 = vmul.f32 1.442695, %v77_v14  ;;  %v66_v32 = vsel %vm64_vm2, %v50_v28, %v60_v29  ;;  %v113_v33 = vsel %vm112_vm3, %v65_v30, 0  ;;  %vm120_vm4 = vcmp.ne.s32.totalorder %v119_v31, 0 }
  0x24   :  { %v81_v24 = vmul.f32 1.442695, %v78_v16  ;;  %v117_v34 = vsel %vm112_vm3, %v66_v32, 0 }
  0x25   :  { %135 = vpow2.f32 %v79_v20 }
  0x26   :  { %137 = vpow2.f32 %v81_v24 }
  0x2f   :  { %v136_v35 = vpop.eup %135 }
  0x30   :  { %v138_v36 = vpop.eup %137  ;;  %v121_v37 = vsel %vm120_vm4, %v136_v35, %v113_v33 }
  0x31   :  { %v125_v38 = vsel %vm120_vm4, %v138_v36, %v117_v34 }
  0x32   :  { %v85_v39 = vadd.f32 %v125_v38, %v121_v37 }
  0x34   :  { %86 = vadd.xlane.f32.xlu0 %v85_v39 }
  0x4e   :  { %s108_s8 = spop %107 }
  0x4f   :  { %v94_v43 = vstv %s108_s8 }
  0xc1   :  { %v87_v40 = vpop.xlane.xlu0 %86 }
  0xc2   :  { %v88_v41 = vmul.f32 0.00390625, %v87_v40 }
  0xc4   :  { %139 = vlog2.f32 %v88_v41 }
  0xce   :  { %v140_v42 = vpop.eup %139 }
  0xcf   :  { %v90_v44 = vmul.f32 0.6931472, %v140_v42 }
  0xd1   :  { %v95_v45 = vmul.f32 %v94_v43, %v90_v44 }
  0xd3   :  { %v96_v46 = vmul.f32 1.442695, %v95_v45 }
  0xd5   :  { %141 = vpow2.f32 %v96_v46 }
  0xdf   :  { %v142_v47 = vpop.eup %141 }
  0xe0   :  { %99 = vst.msk [vmem:[%s233_s2] sm:$0xff] %vm98_vm5, %v142_v47 }
  0xe1   :  { %104 = vsyncpa [#allocation4], 1 }

</bundles_post_ra>
